<compile_context>
chip_gen: v6e
topology: v6e:2x2x1
jax: 0.10.0
libtpu: 0.0.40
codegen_flags: <defaults>
</compile_context>

<pallas_src>
import functools

import jax
import jax.numpy as jnp
from jax.experimental import pallas as pl
from jax.experimental.pallas import tpu as pltpu


def _stem_kernel(a_ref, w_ref, b_ref, o_ref, *, m, wo):
    """One image (one Cout block) per grid step.

    a_ref: [1, Kc, (Ho+1)*Wo] bf16  column-tap/row-parity planes, spatially flat
    w_ref: [2, Cb, Kc]        bf16  folded conv*BN weights, grouped by row shift
    b_ref: [Cb, 1]            f32   folded BN bias
    o_ref: [1, Cb, Ho*Wo]           NCHW-flat output block
    """
    a = a_ref[0]                       # [Kc, (Ho+1)*Wo]
    a0 = a[:, 0:m]                     # taps with output-row shift 0 (kh in {0,1})
    a1 = a[:, wo:wo + m]               # taps with output-row shift 1 (kh == 2)
    acc = jnp.dot(w_ref[0], a0, preferred_element_type=jnp.float32)
    acc = acc + jnp.dot(w_ref[1], a1, preferred_element_type=jnp.float32)
    y = acc + b_ref[...]               # fused BN bias (f32)
    o_ref[0] = jnp.maximum(y, 0.0).astype(o_ref.dtype)   # fused ReLU


def simple_stem_forward(x_nchw, conv_w, gamma, beta, running_mean, running_var,
                        eps=1e-5, stride=2,
                        compute_dtype=jnp.bfloat16, out_dtype=jnp.bfloat16):
    """x_nchw: [N, Cin, H, W]; conv_w: [Cout, Cin, 3, 3] (PyTorch OIHW layout).

    Returns NCHW `out_dtype`, matching SimpleStem.forward with running-stat BN.
    Set compute_dtype/out_dtype to float32 if bit-level parity is required.
    """
    N, Cin, H, W = x_nchw.shape
    Cout, cin_w, KH, KW = conv_w.shape
    assert (KH, KW) == (3, 3) and stride == 2 and cin_w == Cin

    Ho = (H + 2 - KH) // stride + 1
    Wo = (W + 2 - KW) // stride + 1
    M = Ho * Wo                      # flat output spatial size per image
    FW = (Ho + 1) * Wo               # flat slab width (one extra output row)
    Kc = 2 * KW * Cin                # (row parity pr) x (kw) x (cin)

    # ---- single bf16 layout pass: pad + column-tap / row-parity extraction ----
    # slab[n, (pr,kw,cin), oh*Wo + ow] = xp[n, cin, 2*oh + pr, 2*ow + kw],
    # for oh in [0, Ho+1), ow in [0, Wo).  Tap (kh, kw) of the conv is then the
    # slab row (pr = kh % 2 if kh < 2 else 0, kw) read at flat offset dr*Wo,
    # dr = 0 for kh in {0,1} and dr = 1 for kh = 2.
    pad_b = 2 * Ho + 1 - H           # 1 for even H, 2 for odd H
    pad_r = max(2 * Wo - W, 0)       # 0 for even W, 1 for odd W
    xp = jnp.pad(x_nchw.astype(compute_dtype),
                 ((0, 0), (0, 0), (1, pad_b), (1, pad_r)))
    slabs = []
    for pr in range(2):
        for kw in range(KW):
            slabs.append(xp[:, :,
                            pr: pr + 2 * Ho + 1: 2,
                            kw: kw + 2 * Wo - 1: 2])       # [N, Cin, Ho+1, Wo]
    a = jnp.stack(slabs, axis=1).reshape(N, Kc, FW)        # [N, Kc, (Ho+1)*Wo]

    # ---- fold BN (inference / running-stat semantics) into weight + bias ----
    scale = (gamma.astype(jnp.float32) /
             jnp.sqrt(running_var.astype(jnp.float32) + eps))
    bias = (beta.astype(jnp.float32) -
            running_mean.astype(jnp.float32) * scale).reshape(Cout, 1)
    w_s = conv_w.astype(jnp.float32) * scale[:, None, None, None]  # [Cout,Cin,3,3]

    # Group taps by output-row shift dr: dr=0 uses kh in {0,1}; dr=1 uses kh=2
    # (its pr=1 slot corresponds to the nonexistent kh=3 and is zero).
    def regroup(w_cin_pr_kw):        # [Cout, Cin, pr, kw] -> [Cout, (pr, kw, cin)]
        return jnp.transpose(w_cin_pr_kw, (0, 2, 3, 1)).reshape(Cout, Kc)

    w0 = w_s[:, :, 0:2, :]                                            # kh = pr
    w1 = jnp.pad(w_s[:, :, 2:3, :], ((0, 0), (0, 0), (0, 1), (0, 0))) # kh = 2
    wg = jnp.stack([regroup(w0), regroup(w1)], axis=0).astype(compute_dtype)

    # ---- grid: one image per step; split Cout when N == 1 (keep both v7x TCs busy)
    cb = 2 if (N == 1 and Cout % 16 == 0) else 1
    cout_blk = Cout // cb
    grid = (N, cb)

    in_specs = [
        pl.BlockSpec((1, Kc, FW), lambda n, c: (n, 0, 0)),          # input slab
        pl.BlockSpec((2, cout_blk, Kc), lambda n, c: (0, c, 0)),    # folded weights
        pl.BlockSpec((cout_blk, 1), lambda n, c: (c, 0)),           # BN bias
    ]
    out_specs = pl.BlockSpec((1, cout_blk, M), lambda n, c: (n, c, 0))

    # ---- advisory cost + right-sized VMEM limit ----
    out_itemsize = jax.dtypes.canonicalize_dtype(out_dtype).itemsize
    flops = 2 * N * Cout * (2 * Kc) * M
    bytes_accessed = (a.size * a.dtype.itemsize + wg.size * wg.dtype.itemsize
                      + bias.size * 4 + N * Cout * M * out_itemsize)

    def _rup(v, mult):
        return -(-v // mult) * mult

    in_blk = _rup(Kc, 16) * _rup(FW, 128) * 2
    out_blk = _rup(cout_blk, 32 // out_itemsize) * _rup(M, 128) * out_itemsize
    acc_blk = _rup(cout_blk, 8) * _rup(M, 128) * 4
    slc_blk = 2 * _rup(Kc, 16) * _rup(M, 128) * 2          # relayouted a0/a1 copies
    est = 2 * (in_blk + out_blk) + acc_blk + slc_blk + 4 * Cout * Kc + (1 << 20)
    vmem_limit = int(min(max(2 * est, 32 << 20), 112 << 20))

    out = pl.pallas_call(
        functools.partial(_stem_kernel, m=M, wo=Wo),
        out_shape=jax.ShapeDtypeStruct((N, Cout, M), out_dtype),
        grid=grid,
        in_specs=in_specs,
        out_specs=out_specs,
        compiler_params=pltpu.CompilerParams(
            dimension_semantics=("parallel", "parallel"),
            vmem_limit_bytes=vmem_limit),
        cost_estimate=pl.CostEstimate(flops=flops, transcendentals=0,
                                      bytes_accessed=bytes_accessed),
    )(a, wg, bias)

    # Pure metadata reshape: kernel already wrote dense NCHW-flat layout.
    return out.reshape(N, Cout, Ho, Wo)


def _reference(x, conv_w, gamma, beta, mean, var, eps=1e-5, stride=2):
    y = jax.lax.conv_general_dilated(
        x.astype(jnp.float32), conv_w.astype(jnp.float32),
        window_strides=(stride, stride), padding=((1, 1), (1, 1)),
        dimension_numbers=("NCHW", "OIHW", "NCHW"),
        precision=jax.lax.Precision.HIGHEST)
    s = (gamma / jnp.sqrt(var + eps)).reshape(1, -1, 1, 1)
    b = (beta - mean * gamma / jnp.sqrt(var + eps)).reshape(1, -1, 1, 1)
    return jnp.maximum(y * s + b, 0.0)


if __name__ == "__main__":
    key = jax.random.PRNGKey(0)
    k1, k2, k3, k4, k5, k6 = jax.random.split(key, 6)

    N, Cin, H, W = 2, 4, 16, 16     # small synthetic shapes
    Cout = 8

    x = jax.random.normal(k1, (N, Cin, H, W), dtype=jnp.float32)
    conv_w = jax.random.normal(k2, (Cout, Cin, 3, 3), dtype=jnp.float32) * 0.1
    gamma = 1.0 + 0.1 * jax.random.normal(k3, (Cout,), dtype=jnp.float32)
    beta = 0.1 * jax.random.normal(k4, (Cout,), dtype=jnp.float32)
    running_mean = 0.1 * jax.random.normal(k5, (Cout,), dtype=jnp.float32)
    running_var = jnp.abs(jax.random.normal(k6, (Cout,), dtype=jnp.float32)) + 0.5

    fwd = jax.jit(simple_stem_forward)   # lets the bf16 layout pass fuse in XLA
    out = jax.block_until_ready(fwd(x, conv_w, gamma, beta,
                                    running_mean, running_var))

    ref = _reference(x, conv_w, gamma, beta, running_mean, running_var)
    assert out.shape == (N, Cout, H // 2, W // 2), out.shape
    out_f32 = out.astype(jnp.float32)
    max_err = float(jnp.max(jnp.abs(out_f32 - ref)))
    # bf16 activations/weights/output (f32 MXU accumulation) -> relaxed tolerance.
    assert jnp.allclose(out_f32, ref, atol=2e-2, rtol=2e-2), max_err

    print("KERNEL_OK")
</pallas_src>

<mosaic_0001>
module attributes {stable_mosaic.version = 11 : i64} {
  func.func @_stem_kernel(%arg0: i32, %arg1: i32, %arg2: memref<1x24x72xbf16, #tpu.memory_space<vmem>>, %arg3: memref<2x8x24xbf16, #tpu.memory_space<vmem>>, %arg4: memref<8x1xf32, #tpu.memory_space<vmem>>, %arg5: memref<1x8x64xbf16, #tpu.memory_space<vmem>>) attributes {dimension_semantics = [#tpu.dimension_semantics<parallel>, #tpu.dimension_semantics<parallel>], iteration_bounds = array<i64: 2, 1>, scalar_prefetch = 0 : i64, scratch_operands = 0 : i64, tpu.core_type = #tpu.core_type<tc>, window_params = [{transform_indices = @transform_0, window_bounds = array<i64: 1, 24, 72>}, {transform_indices = @transform_1, window_bounds = array<i64: 2, 8, 24>}, {transform_indices = @transform_2, window_bounds = array<i64: 8, 1>}, {transform_indices = @transform_3, window_bounds = array<i64: 1, 8, 64>}]} {
    %c0 = arith.constant 0 : index
    %c0_0 = arith.constant 0 : index
    %c0_1 = arith.constant 0 : index
    %0 = vector.load %arg2[%c0, %c0_0, %c0_1] : memref<1x24x72xbf16, #tpu.memory_space<vmem>>, vector<1x24x72xbf16>
    %1 = vector.shape_cast %0 : vector<1x24x72xbf16> to vector<24x72xbf16>
    %2 = vector.extract_strided_slice %1 {offsets = [0, 0], sizes = [24, 64], strides = [1, 1]} : vector<24x72xbf16> to vector<24x64xbf16>
    %3 = vector.extract_strided_slice %1 {offsets = [0, 8], sizes = [24, 64], strides = [1, 1]} : vector<24x72xbf16> to vector<24x64xbf16>
    %c0_2 = arith.constant 0 : index
    %c0_3 = arith.constant 0 : index
    %c0_4 = arith.constant 0 : index
    %4 = vector.load %arg3[%c0_2, %c0_3, %c0_4] : memref<2x8x24xbf16, #tpu.memory_space<vmem>>, vector<1x8x24xbf16>
    %5 = vector.shape_cast %4 : vector<1x8x24xbf16> to vector<8x24xbf16>
    %cst = arith.constant dense<0.000000e+00> : vector<8x64xf32>
    %6 = tpu.matmul %5, %2, %cst {dimension_numbers = #tpu.dot_dimension_numbers<[1], [0], [0], [1], [0, 0, 1, 1], [], []>} : vector<8x24xbf16>, vector<24x64xbf16>, vector<8x64xf32> -> vector<8x64xf32>
    %c1 = arith.constant 1 : index
    %c0_5 = arith.constant 0 : index
    %c0_6 = arith.constant 0 : index
    %7 = vector.load %arg3[%c1, %c0_5, %c0_6] : memref<2x8x24xbf16, #tpu.memory_space<vmem>>, vector<1x8x24xbf16>
    %8 = vector.shape_cast %7 : vector<1x8x24xbf16> to vector<8x24xbf16>
    %cst_7 = arith.constant dense<0.000000e+00> : vector<8x64xf32>
    %9 = tpu.matmul %8, %3, %cst_7 {dimension_numbers = #tpu.dot_dimension_numbers<[1], [0], [0], [1], [0, 0, 1, 1], [], []>} : vector<8x24xbf16>, vector<24x64xbf16>, vector<8x64xf32> -> vector<8x64xf32>
    %10 = arith.addf %6, %9 : vector<8x64xf32>
    %c0_8 = arith.constant 0 : index
    %c0_9 = arith.constant 0 : index
    %11 = vector.load %arg4[%c0_8, %c0_9] : memref<8x1xf32, #tpu.memory_space<vmem>>, vector<8x1xf32>
    %12 = vector.broadcast %11 : vector<8x1xf32> to vector<8x64xf32>
    %13 = arith.addf %10, %12 : vector<8x64xf32>
    %cst_10 = arith.constant 0.000000e+00 : f32
    %14 = vector.broadcast %cst_10 : f32 to vector<8x64xf32>
    %15 = arith.maximumf %13, %14 : vector<8x64xf32>
    %16 = arith.truncf %15 : vector<8x64xf32> to vector<8x64xbf16>
    %c0_11 = arith.constant 0 : index
    %c0_12 = arith.constant 0 : index
    %c0_13 = arith.constant 0 : index
    %17 = vector.load %arg5[%c0_11, %c0_12, %c0_13] : memref<1x8x64xbf16, #tpu.memory_space<vmem>>, vector<1x8x64xbf16>
    %18 = vector.shape_cast %17 : vector<1x8x64xbf16> to vector<8x64xbf16>
    %19 = vector.shape_cast %16 : vector<8x64xbf16> to vector<1x8x64xbf16>
    tpu.vector_store %arg5[%c0_11, %c0_12, %c0_13], %19 {strides = array<i32>} : memref<1x8x64xbf16, #tpu.memory_space<vmem>>, vector<1x8x64xbf16>,
    return
  }
  func.func @transform_0(%arg0: i32, %arg1: i32) -> (i32, i32, i32) {
    %c0_i32 = arith.constant 0 : i32
    %c0_i32_0 = arith.constant 0 : i32
    %c0_i32_1 = arith.constant 0 : i32
    return %arg0, %c0_i32, %c0_i32_0 : i32, i32, i32
  }
  func.func @transform_1(%arg0: i32, %arg1: i32) -> (i32, i32, i32) {
    %c0_i32 = arith.constant 0 : i32
    %c0_i32_0 = arith.constant 0 : i32
    %c0_i32_1 = arith.constant 0 : i32
    return %c0_i32, %arg1, %c0_i32_0 : i32, i32, i32
  }
  func.func @transform_2(%arg0: i32, %arg1: i32) -> (i32, i32) {
    %c0_i32 = arith.constant 0 : i32
    %c0_i32_0 = arith.constant 0 : i32
    return %arg1, %c0_i32 : i32, i32
  }
  func.func @transform_3(%arg0: i32, %arg1: i32) -> (i32, i32, i32) {
    %c0_i32 = arith.constant 0 : i32
    %c0_i32_0 = arith.constant 0 : i32
    return %arg0, %arg1, %c0_i32 : i32, i32, i32
  }
}

</mosaic_0001>

<bundles_post_ra>
// kernel: simple_stem_forward.1
= control target key start
LH: loop header
LB: loop body
LE: loop exit
PB: predicated region body
PF: predicated region fallthrough
CT: control target
= control target key end

     0   :  { %s570_s12 = smov 0   ;;  %s572_s13 = smov 0   ;;  %s616_s0 = inlined_call_operand.vmem [shape: bf16[2,24,72], index: 0, kind: input, shape index: {}]   ;;  %s617_s1 = inlined_call_operand.vmem [shape: bf16[2,8,24], index: 1, kind: input, shape index: {}]   ;;  %s618_s2 = inlined_call_operand.vmem [shape: f32[8,1], index: 2, kind: input, shape index: {}]   ;;  %s619_s3 = inlined_call_operand.vmem [shape: bf16[2,8,64], index: 3, kind: output, shape index: {}]  }
   0x1   :  { %s574_s14 = smov 0  }
   0x2 LB: > { %s25_s15 = sadd.s32 1, %s540_s13  ;;  %p457_p0 = scmp.ge.s32.totalorder %s544_s14, 1  ;;  %s544_s14 = sphi %s574_s14, %s13_s14   ;;  %s540_s13 = sphi %s572_s13, %s621_s13   ;;  %s536_s12 = sphi %s570_s12, %s620_s12  }
   0x3   : > { %p27_p1 = scmp.ge.s32.totalorder %s25_s15, 2  ;;  %p169_p2 = scmp.lt.s32.totalorder %s544_s14, 3 }
   0x5   : > { %s623_s15 = smov (%p27_p1, %s25_s15), 0  ;;  %p170_p3 = pnand %p457_p0, %p169_p2 }
   0x6   : > { %p203_p4 = scmp.lt.s32.totalorder (!%p170_p3), %s536_s12, 1  ;;  %s549_s22 = smov (!%p170_p3), 120  }
   0x7   : > { %173 = sbr.rel (%p170_p3) target bundleno = 342 (0x156), region = 32 }
   0xc   : > { %v546_v0 = vmov 0.0   ;;  %s625_s12 = smov (!%p203_p4, %s536_s12), 1  ;;  %vm547_vm0 = vmmov 0   ;;  %v338_v1 = vld [vmem:[%s618_s2] sm:$0xff]  ;;  %v548_v2 = vmov 0   ;;  %vm247_vm1 = vcmask 1043456  }
   0xd   : > { %481 = vmatprep.subr.bf16.mxu1 %v546_v0  ;;  %473 = vmatprep.subr.bf16.mxu0 %v546_v0  ;;  %s489_s16 = smul.u32 12, %s625_s12  ;;  %v227_v6 = vld [vmem:[%s617_s1] sm:$0xf]  ;;  %vm243_vm2 = vcmask 195584   ;;  %v460_v10 = vld [vmem:[%s617_s1 + $0x4] sm:$0xf] }
   0xe   : > { %485 = vmatprep.mubr.msk.bf16.mxu1 %vm547_vm0, %v546_v0  ;;  %477 = vmatprep.mubr.msk.bf16.mxu0 %vm547_vm0, %v546_v0  ;;  %s459_s27 = sshll.u32 %s625_s12, 2  ;;  %vm347_vm3 = vcmask 519168  }
   0xf   : > { %518 = vset.pattern.permute.xlu1 %v548_v2  ;;  %519 = vset.pattern.permute.xlu0 %v548_v2  ;;  %s207_s21 = scalar_lea.vmem %s616_s0, %s489_s16  ;;  %s222_s30 = scalar_lea.vmem %s619_s3, %s459_s27 }
  0x10   : > { %341 = vperm.xlu1 %518, %v338_v1   ;;  %v520_v3 = vld [vmem:[%s207_s21 + $0x8] ss:$0 sps:$4 sm:$0xff]   ;;  %v521_v4 = vld [vmem:[%s207_s21] sm:$0xff]  }
  0x11   : > { %240 = vrot.lane.b32.xlu0 %v520_v3, %s549_s22  ;;  %v296_v5 = vsel %vm247_vm1, %v520_v3, 0 }
  0x12   : > { %482 = vmatpush3.bf16.msra.mxu1 %v296_v5 }
  0x13   : > { %483 = vmatprep.subr.bf16.mxu1 %v546_v0 }
  0x15   : > { %238 = vrot.lane.b32.xlu0 %v521_v4, %s549_s22 }
  0x16   : > { %484 = vmatpush3.bf16.msra.mxu1 %v521_v4 }
  0x19   : > { %486 = vmatmul.mubr.msk.bf16.vlgmr.msra.gmra.mxu1 %vm243_vm2, %v227_v6 }
  0x83   : > { %v241_v7 = vpop.permute.xlu0 %240 }
  0x84   : > { %v249_v8 = vsel %vm247_vm1, %v241_v7, 0 }
  0x85   : > { %474 = vmatpush3.bf16.msra.mxu0 %v249_v8 }
  0x86   : > { %475 = vmatprep.subr.bf16.mxu0 %v546_v0 }
  0x87   : > { %v239_v9 = vpop.permute.xlu0 %238 }
  0x89   : > { %476 = vmatpush3.bf16.msra.mxu0 %v239_v9 }
  0x8b   : > { %v342_v16 = vpop.permute.xlu1 %341 }
  0x8c   : > { %478 = vmatmul.mubr.msk.bf16.vlgmr.msra.gmra.mxu0 %vm243_vm2, %v460_v10 }
  0xd9   : > { %v332_v11 = vpop.f32.mrf.mxu1 }
  0xdb   : > { %v487_v12 = vpop.f32.mrf.mxu1 }
  0xdd   : > { %v335_v13 = vpop.f32.mrf.mxu1 }
  0xdf   : > { %v488_v14 = vpop.f32.mrf.mxu1 }
 0x14c   : > { %v285_v15 = vpop.f32.mrf.mxu0 }
 0x14d   : > { %v333_v17 = vadd.f32 %v332_v11, %v285_v15 }
 0x14e   : > { %v479_v18 = vpop.f32.mrf.mxu0 }
 0x14f   : > { %v344_v19 = vadd.f32 %v342_v16, %v333_v17 }
 0x150   : > { %v288_v20 = vpop.f32.mrf.mxu0 }
 0x151   : > { %v345_v21 = vmax.f32 %v344_v19, 0.0 }
 0x152   : > { %v480_v22 = vpop.f32.mrf.mxu0 }
 0x153   : > { %v346_v23 = vpack.c.bf16 %v345_v21, %v345_v21 }
 0x155   : > { %348 = vst.msk [vmem:[%s222_s30] sm:$0xf] %vm347_vm3, %v346_v23 }
 0x156 PF: > { %s13_s14 = sadd.s32 1, %s544_s14   ;;  %s620_s12 = smov %s540_s13 }
 0x157   : > { %p10_p5 = scmp.ge.s32.totalorder %s13_s14, 4   ;;  %s621_s13 = smov %s623_s15 }
 0x159   :  { %12 = sbr.rel (!%p10_p5) target bundleno = 2 (0x2), region = 69 }

</bundles_post_ra>
